<compile_context>
chip_gen: v7x
topology: tpu7x:2x2x1
jax: 0.10.0
libtpu: 0.0.40
codegen_flags: <defaults>
</compile_context>

<pallas_src>
import functools

import jax
import jax.numpy as jnp
from jax import lax
from jax.experimental import pallas as pl
from jax.experimental.pallas import tpu as pltpu

BN_EPS = 1e-5
EXPANSION = 4


# ------------------------------- kernel ----------------------------------- #

def _bn_train(h, gamma, beta):
    """BatchNorm1d (training mode) over rows (= B*L), biased variance.

    One reduction pass (mean, mean of squares) + one fused scale/shift:
      scale = gamma * rsqrt(var + eps); shift = beta - mean * scale.
    All math in f32 (VPU-native on v5e/v6e/v7x).
    """
    mean = jnp.mean(h, axis=0, keepdims=True)
    var = jnp.maximum(jnp.mean(h * h, axis=0, keepdims=True) - mean * mean, 0.0)
    scale = gamma * lax.rsqrt(var + BN_EPS)
    return h * scale + (beta - mean * scale)


def bottleneck_kernel(*refs, seq_len, has_proj):
    if has_proj:
        (x_ref, w1_ref, g1_ref, b1_ref,
         w2_ref, g2_ref, b2_ref,
         w3_ref, g3_ref, b3_ref,
         wsc_ref, gsc_ref, bsc_ref, out_ref) = refs
    else:
        (x_ref, w1_ref, g1_ref, b1_ref,
         w2_ref, g2_ref, b2_ref,
         w3_ref, g3_ref, b3_ref, out_ref) = refs

    x = x_ref[...]                         # (R, Cin_pad) f32, R = B*L
    n_rows = x.shape[0]
    x_bf = x.astype(jnp.bfloat16)          # bf16 only at MXU inputs

    # ---- conv1 (1x1) -> bn1 -> relu ----
    h1 = jnp.dot(x_bf, w1_ref[...], preferred_element_type=jnp.float32)
    h1 = jnp.maximum(_bn_train(h1, g1_ref[...], b1_ref[...]), 0.0)

    # ---- conv2 (k=3, padding=1, stride=1) -> bn2 -> relu ----
    # +/-1 row shifts via XLU roll + boundary mask: rows with l==0 / l==L-1
    # are zeroed, which also blocks batch-boundary crossings (row r = b*L + l).
    l_idx = lax.broadcasted_iota(jnp.int32, (n_rows, 1), 0) % seq_len
    h_prev = jnp.where(l_idx == 0, 0.0, pltpu.roll(h1, shift=1, axis=0))
    h_next = jnp.where(l_idx == seq_len - 1, 0.0,
                       pltpu.roll(h1, shift=n_rows - 1, axis=0))
    # three taps fused into one MXU call with K = 3 * planes_pad
    h_cat = jnp.concatenate([h_prev.astype(jnp.bfloat16),
                             h1.astype(jnp.bfloat16),
                             h_next.astype(jnp.bfloat16)], axis=1)
    h2 = jnp.dot(h_cat, w2_ref[...], preferred_element_type=jnp.float32)
    h2 = jnp.maximum(_bn_train(h2, g2_ref[...], b2_ref[...]), 0.0)

    # ---- conv3 (1x1) -> bn3 ----
    h3 = jnp.dot(h2.astype(jnp.bfloat16), w3_ref[...],
                 preferred_element_type=jnp.float32)
    h3 = _bn_train(h3, g3_ref[...], b3_ref[...])

    # ---- shortcut ----
    if has_proj:
        sc = jnp.dot(x_bf, wsc_ref[...], preferred_element_type=jnp.float32)
        sc = _bn_train(sc, gsc_ref[...], bsc_ref[...])
    else:
        sc = x          # identity (padded lanes of x are exactly zero)

    out_ref[...] = jnp.maximum(h3 + sc, 0.0)


# ------------------------------- wrappers ---------------------------------- #

def _round_up(n, m=128):
    return ((n + m - 1) // m) * m


def bottleneck_rows_forward(x_rows, params, *, planes, seq_len, stride=1):
    """Channels-last rows-layout core.

    x_rows: (B*L, >=in_planes) f32, channels in the lane dim, row r = b*L + l.
    Returns (B*L, cout_pad) f32; real channels in the first 4*planes lanes,
    padded lanes exactly zero, so stacked Bottleneck blocks can chain outputs
    directly (no NCL<->rows transpose round-trip per block).
    """
    if stride != 1:
        # TODO(synk): strided conv2 / strided projection shortcut not implemented.
        raise NotImplementedError("only stride=1 is implemented")

    cin = params["conv1_w"].shape[1]
    cout = EXPANSION * planes
    has_proj = (stride != 1) or (cin != cout)

    cin_pad = _round_up(max(cin, x_rows.shape[1]))
    p_pad = _round_up(planes)
    cout_pad = _round_up(cout)
    n_rows = x_rows.shape[0]

    def pad_mat(w, rows, cols):        # MXU operand -> bf16, zero-padded
        w = w.astype(jnp.float32)
        return jnp.pad(w, ((0, rows - w.shape[0]),
                           (0, cols - w.shape[1]))).astype(jnp.bfloat16)

    def pad_vec(v, cols):              # BN affine stays f32
        v = v.astype(jnp.float32).reshape(1, -1)
        return jnp.pad(v, ((0, 0), (0, cols - v.shape[1])))

    x_pad = jnp.pad(x_rows.astype(jnp.float32),
                    ((0, 0), (0, cin_pad - x_rows.shape[1])))

    # conv2 taps stacked along the contraction dim: [x[l-1]; x[l]; x[l+1]]
    w2 = jnp.concatenate(
        [pad_mat(params["conv2_w"][:, :, k].T, p_pad, p_pad) for k in range(3)],
        axis=0)                                               # (3*p_pad, p_pad)

    args = [
        x_pad,
        pad_mat(params["conv1_w"][:, :, 0].T, cin_pad, p_pad),
        pad_vec(params["bn1_g"], p_pad), pad_vec(params["bn1_b"], p_pad),
        w2,
        pad_vec(params["bn2_g"], p_pad), pad_vec(params["bn2_b"], p_pad),
        pad_mat(params["conv3_w"][:, :, 0].T, p_pad, cout_pad),
        pad_vec(params["bn3_g"], cout_pad), pad_vec(params["bn3_b"], cout_pad),
    ]
    if has_proj:
        args += [
            pad_mat(params["sc_w"][:, :, 0].T, cin_pad, cout_pad),
            pad_vec(params["sc_g"], cout_pad), pad_vec(params["sc_b"], cout_pad),
        ]

    kernel = functools.partial(bottleneck_kernel, seq_len=seq_len,
                               has_proj=has_proj)
    # Single VMEM block (no grid): training-mode BatchNorm couples every row
    # three times in a row, so the whole batch is normalized in one shot.
    return pl.pallas_call(
        kernel,
        out_shape=jax.ShapeDtypeStruct((n_rows, cout_pad), jnp.float32),
        in_specs=[pl.BlockSpec(memory_space=pltpu.MemorySpace.VMEM)] * len(args),
        out_specs=pl.BlockSpec(memory_space=pltpu.MemorySpace.VMEM),
        compiler_params=pltpu.CompilerParams(
            vmem_limit_bytes=48 * 1024 * 1024),   # sized for v7x's 64 MiB VMEM
    )(*args)


def bottleneck_forward(x, params, *, planes, stride=1):
    """PyTorch-layout adapter: x (B, C_in, L) float32 -> (B, 4*planes, L)."""
    B, cin, L = x.shape
    cout = EXPANSION * planes
    x_rows = jnp.transpose(x.astype(jnp.float32), (0, 2, 1)).reshape(B * L, cin)
    out_rows = bottleneck_rows_forward(x_rows, params, planes=planes,
                                       seq_len=L, stride=stride)
    return out_rows[:, :cout].reshape(B, L, cout).transpose(0, 2, 1)


# ----------------------------- pure-JAX reference -------------------------- #

def _reference_bottleneck(x, params, *, planes, stride=1,
                          matmul_dtype=jnp.float32):
    prec = lax.Precision.HIGHEST if matmul_dtype == jnp.float32 else None

    def mm(w2d, h):      # w2d: (Cout, Cin), h: (B, Cin, L)
        return jnp.einsum('oc,bcl->bol', w2d.astype(matmul_dtype),
                          h.astype(matmul_dtype), precision=prec,
                          preferred_element_type=jnp.float32)

    def conv1x1(h, w):   # w: (Cout, Cin, 1)
        return mm(w[:, :, 0], h)

    def conv3(h, w):     # w: (Cout, Cin, 3), padding=1, stride=1
        hp = jnp.pad(h, ((0, 0), (0, 0), (1, 1)))
        return (mm(w[:, :, 0], hp[:, :, :-2]) + mm(w[:, :, 1], hp[:, :, 1:-1])
                + mm(w[:, :, 2], hp[:, :, 2:]))

    def bn(h, g, b):
        mean = jnp.mean(h, axis=(0, 2), keepdims=True)
        var = jnp.mean((h - mean) ** 2, axis=(0, 2), keepdims=True)
        return ((h - mean) * lax.rsqrt(var + BN_EPS)
                * g[None, :, None] + b[None, :, None])

    cin = x.shape[1]
    cout = EXPANSION * planes
    out = jnp.maximum(bn(conv1x1(x, params["conv1_w"]),
                         params["bn1_g"], params["bn1_b"]), 0.0)
    out = jnp.maximum(bn(conv3(out, params["conv2_w"]),
                         params["bn2_g"], params["bn2_b"]), 0.0)
    out = bn(conv1x1(out, params["conv3_w"]), params["bn3_g"], params["bn3_b"])
    if stride != 1 or cin != cout:
        sc = bn(conv1x1(x, params["sc_w"]), params["sc_g"], params["sc_b"])
    else:
        sc = x
    return jnp.maximum(out + sc, 0.0)


# ------------------------------ setup / main -------------------------------- #

def init_params(key, in_planes, planes):
    cout = EXPANSION * planes
    ks = jax.random.split(key, 10)

    def w(k, shape):
        return 0.1 * jax.random.normal(k, shape, jnp.float32)

    return {
        "conv1_w": w(ks[0], (planes, in_planes, 1)),
        "bn1_g": 1.0 + 0.1 * jax.random.normal(ks[1], (planes,), jnp.float32),
        "bn1_b": 0.1 * jax.random.normal(ks[2], (planes,), jnp.float32),
        "conv2_w": w(ks[3], (planes, planes, 3)),
        "bn2_g": 1.0 + 0.1 * jax.random.normal(ks[4], (planes,), jnp.float32),
        "bn2_b": 0.1 * jax.random.normal(ks[5], (planes,), jnp.float32),
        "conv3_w": w(ks[6], (cout, planes, 1)),
        "bn3_g": 1.0 + 0.1 * jax.random.normal(ks[7], (cout,), jnp.float32),
        "bn3_b": 0.1 * jax.random.normal(ks[8], (cout,), jnp.float32),
        # projection shortcut (used because in_planes != 4*planes in the demo)
        "sc_w": w(ks[9], (cout, in_planes, 1)),
        "sc_g": jnp.ones((cout,), jnp.float32),
        "sc_b": jnp.zeros((cout,), jnp.float32),
    }


if __name__ == "__main__":
    B, IN_PLANES, L = 2, 4, 16
    PLANES = 4        # out channels = 4 * PLANES = 16 -> projection shortcut

    key = jax.random.PRNGKey(0)
    kx, kp = jax.random.split(key)
    x = jax.random.normal(kx, (B, IN_PLANES, L), jnp.float32)
    params = init_params(kp, IN_PLANES, PLANES)

    fwd = jax.jit(functools.partial(bottleneck_forward, planes=PLANES))
    out = fwd(x, params)
    jax.block_until_ready(out)
    assert out.shape == (B, EXPANSION * PLANES, L)

    # Plumbing check: reference with matched bf16 matmul operands -> tight tol.
    ref_bf16 = _reference_bottleneck(x, params, planes=PLANES,
                                     matmul_dtype=jnp.bfloat16)
    err_bf16 = float(jnp.max(jnp.abs(out - ref_bf16)))
    assert err_bf16 < 5e-3, f"kernel vs bf16-matched reference: {err_bf16}"

    # Sanity check vs full-f32 reference (bf16 MXU operands are a deliberate
    # throughput choice on v5e/v6e/v7x; error stays small vs O(1) activations).
    ref_f32 = _reference_bottleneck(x, params, planes=PLANES)
    err_f32 = float(jnp.max(jnp.abs(out - ref_f32)))
    assert err_f32 < 0.25, f"kernel vs f32 reference: {err_f32}"

    print("KERNEL_OK")
</pallas_src>

<mosaic_0001>
module attributes {stable_mosaic.version = 11 : i64} {
  func.func @bottleneck_kernel(%arg0: memref<32x128xf32, #tpu.memory_space<vmem>>, %arg1: memref<128x128xbf16, #tpu.memory_space<vmem>>, %arg2: memref<1x128xf32, #tpu.memory_space<vmem>>, %arg3: memref<1x128xf32, #tpu.memory_space<vmem>>, %arg4: memref<384x128xbf16, #tpu.memory_space<vmem>>, %arg5: memref<1x128xf32, #tpu.memory_space<vmem>>, %arg6: memref<1x128xf32, #tpu.memory_space<vmem>>, %arg7: memref<128x128xbf16, #tpu.memory_space<vmem>>, %arg8: memref<1x128xf32, #tpu.memory_space<vmem>>, %arg9: memref<1x128xf32, #tpu.memory_space<vmem>>, %arg10: memref<128x128xbf16, #tpu.memory_space<vmem>>, %arg11: memref<1x128xf32, #tpu.memory_space<vmem>>, %arg12: memref<1x128xf32, #tpu.memory_space<vmem>>, %arg13: memref<32x128xf32, #tpu.memory_space<vmem>>) attributes {dimension_semantics = [], scalar_prefetch = 0 : i64, scratch_operands = 0 : i64, tpu.core_type = #tpu.core_type<tc>} {
    %c0 = arith.constant 0 : index
    %c0_0 = arith.constant 0 : index
    %0 = vector.load %arg0[%c0, %c0_0] : memref<32x128xf32, #tpu.memory_space<vmem>>, vector<32x128xf32>
    %1 = arith.truncf %0 : vector<32x128xf32> to vector<32x128xbf16>
    %c0_1 = arith.constant 0 : index
    %c0_2 = arith.constant 0 : index
    %2 = vector.load %arg1[%c0_1, %c0_2] : memref<128x128xbf16, #tpu.memory_space<vmem>>, vector<128x128xbf16>
    %cst = arith.constant dense<0.000000e+00> : vector<32x128xf32>
    %3 = tpu.matmul %1, %2, %cst {dimension_numbers = #tpu.dot_dimension_numbers<[1], [0], [0], [1], [0, 0, 1, 1], [], []>} : vector<32x128xbf16>, vector<128x128xbf16>, vector<32x128xf32> -> vector<32x128xf32>
    %c0_3 = arith.constant 0 : index
    %c0_4 = arith.constant 0 : index
    %4 = vector.load %arg2[%c0_3, %c0_4] : memref<1x128xf32, #tpu.memory_space<vmem>>, vector<1x128xf32>
    %c0_5 = arith.constant 0 : index
    %c0_6 = arith.constant 0 : index
    %5 = vector.load %arg3[%c0_5, %c0_6] : memref<1x128xf32, #tpu.memory_space<vmem>>, vector<1x128xf32>
    %cst_7 = arith.constant dense<0.000000e+00> : vector<128xf32>
    %6 = vector.multi_reduction <add>, %3, %cst_7 [0] : vector<32x128xf32> to vector<128xf32>
    %7 = vector.shape_cast %6 : vector<128xf32> to vector<1x128xf32>
    %cst_8 = arith.constant 3.200000e+01 : f32
    %8 = vector.broadcast %cst_8 : f32 to vector<1x128xf32>
    %9 = arith.divf %7, %8 : vector<1x128xf32>
    %10 = arith.mulf %3, %3 : vector<32x128xf32>
    %cst_9 = arith.constant dense<0.000000e+00> : vector<128xf32>
    %11 = vector.multi_reduction <add>, %10, %cst_9 [0] : vector<32x128xf32> to vector<128xf32>
    %12 = vector.shape_cast %11 : vector<128xf32> to vector<1x128xf32>
    %cst_10 = arith.constant 3.200000e+01 : f32
    %13 = vector.broadcast %cst_10 : f32 to vector<1x128xf32>
    %14 = arith.divf %12, %13 : vector<1x128xf32>
    %15 = arith.mulf %9, %9 : vector<1x128xf32>
    %16 = arith.subf %14, %15 : vector<1x128xf32>
    %cst_11 = arith.constant 0.000000e+00 : f32
    %17 = vector.broadcast %cst_11 : f32 to vector<1x128xf32>
    %18 = arith.maximumf %16, %17 : vector<1x128xf32>
    %cst_12 = arith.constant 9.99999974E-6 : f32
    %19 = vector.broadcast %cst_12 : f32 to vector<1x128xf32>
    %20 = arith.addf %18, %19 : vector<1x128xf32>
    %21 = math.rsqrt %20 : vector<1x128xf32>
    %22 = arith.mulf %4, %21 : vector<1x128xf32>
    %23 = vector.broadcast %22 : vector<1x128xf32> to vector<32x128xf32>
    %24 = arith.mulf %3, %23 : vector<32x128xf32>
    %25 = arith.mulf %9, %22 : vector<1x128xf32>
    %26 = arith.subf %5, %25 : vector<1x128xf32>
    %27 = vector.broadcast %26 : vector<1x128xf32> to vector<32x128xf32>
    %28 = arith.addf %24, %27 : vector<32x128xf32>
    %cst_13 = arith.constant 0.000000e+00 : f32
    %29 = vector.broadcast %cst_13 : f32 to vector<32x128xf32>
    %30 = arith.maximumf %28, %29 : vector<32x128xf32>
    %31 = tpu.iota {dimensions = array<i32: 0>} : vector<32x1xi32>
    %c16_i32 = arith.constant 16 : i32
    %c0_i32 = arith.constant 0 : i32
    %32 = arith.cmpi eq, %c16_i32, %c0_i32 : i32
    %c1_i32 = arith.constant 1 : i32
    %33 = arith.select %32, %c1_i32, %c16_i32 : i32
    %34 = vector.broadcast %33 : i32 to vector<32x1xi32>
    %35 = arith.remsi %31, %34 : vector<32x1xi32>
    %c0_i32_14 = arith.constant 0 : i32
    %36 = vector.broadcast %c0_i32_14 : i32 to vector<32x1xi32>
    %37 = arith.cmpi ne, %35, %36 : vector<32x1xi32>
    %c0_i32_15 = arith.constant 0 : i32
    %38 = vector.broadcast %c0_i32_15 : i32 to vector<32x1xi32>
    %39 = arith.cmpi slt, %35, %38 : vector<32x1xi32>
    %c0_i32_16 = arith.constant 0 : i32
    %40 = arith.cmpi slt, %33, %c0_i32_16 : i32
    %41 = vector.broadcast %40 : i1 to vector<32x1xi1>
    %42 = vector.broadcast %41 : vector<32x1xi1> to vector<32x1xi1>
    %43 = arith.xori %39, %42 : vector<32x1xi1>
    %44 = arith.andi %43, %37 : vector<32x1xi1>
    %45 = vector.broadcast %33 : i32 to vector<32x1xi32>
    %46 = arith.addi %35, %45 : vector<32x1xi32>
    %47 = arith.select %44, %46, %35 : vector<32x1xi1>, vector<32x1xi32>
    %c0_i32_17 = arith.constant 0 : i32
    %48 = vector.broadcast %c0_i32_17 : i32 to vector<32x1xi32>
    %49 = arith.cmpi eq, %47, %48 : vector<32x1xi32>
    %c1_i32_18 = arith.constant 1 : i32
    %50 = tpu.dynamic_rotate %30 by %c1_i32_18 dim 0 : vector<32x128xf32>, i32 -> vector<32x128xf32>
    %cst_19 = arith.constant 0.000000e+00 : f32
    %51 = vector.shape_cast %49 : vector<32x1xi1> to vector<32x1xi1>
    %52 = vector.broadcast %51 : vector<32x1xi1> to vector<32x128xi1>
    %53 = vector.broadcast %cst_19 : f32 to vector<32x128xf32>
    %54 = arith.select %52, %53, %50 : vector<32x128xi1>, vector<32x128xf32>
    %c15_i32 = arith.constant 15 : i32
    %55 = vector.broadcast %c15_i32 : i32 to vector<32x1xi32>
    %56 = arith.cmpi eq, %47, %55 : vector<32x1xi32>
    %c31_i32 = arith.constant 31 : i32
    %57 = tpu.dynamic_rotate %30 by %c31_i32 dim 0 : vector<32x128xf32>, i32 -> vector<32x128xf32>
    %cst_20 = arith.constant 0.000000e+00 : f32
    %58 = vector.shape_cast %56 : vector<32x1xi1> to vector<32x1xi1>
    %59 = vector.broadcast %58 : vector<32x1xi1> to vector<32x128xi1>
    %60 = vector.broadcast %cst_20 : f32 to vector<32x128xf32>
    %61 = arith.select %59, %60, %57 : vector<32x128xi1>, vector<32x128xf32>
    %62 = arith.truncf %54 : vector<32x128xf32> to vector<32x128xbf16>
    %63 = arith.truncf %30 : vector<32x128xf32> to vector<32x128xbf16>
    %64 = arith.truncf %61 : vector<32x128xf32> to vector<32x128xbf16>
    %65 = tpu.concatenate %62, %63, %64 in 1 : vector<32x128xbf16>, vector<32x128xbf16>, vector<32x128xbf16> -> vector<32x384xbf16>
    %c0_21 = arith.constant 0 : index
    %c0_22 = arith.constant 0 : index
    %66 = vector.load %arg4[%c0_21, %c0_22] : memref<384x128xbf16, #tpu.memory_space<vmem>>, vector<384x128xbf16>
    %cst_23 = arith.constant dense<0.000000e+00> : vector<32x128xf32>
    %67 = tpu.matmul %65, %66, %cst_23 {dimension_numbers = #tpu.dot_dimension_numbers<[1], [0], [0], [1], [0, 0, 1, 1], [], []>} : vector<32x384xbf16>, vector<384x128xbf16>, vector<32x128xf32> -> vector<32x128xf32>
    %c0_24 = arith.constant 0 : index
    %c0_25 = arith.constant 0 : index
    %68 = vector.load %arg5[%c0_24, %c0_25] : memref<1x128xf32, #tpu.memory_space<vmem>>, vector<1x128xf32>
    %c0_26 = arith.constant 0 : index
    %c0_27 = arith.constant 0 : index
    %69 = vector.load %arg6[%c0_26, %c0_27] : memref<1x128xf32, #tpu.memory_space<vmem>>, vector<1x128xf32>
    %cst_28 = arith.constant dense<0.000000e+00> : vector<128xf32>
    %70 = vector.multi_reduction <add>, %67, %cst_28 [0] : vector<32x128xf32> to vector<128xf32>
    %71 = vector.shape_cast %70 : vector<128xf32> to vector<1x128xf32>
    %cst_29 = arith.constant 3.200000e+01 : f32
    %72 = vector.broadcast %cst_29 : f32 to vector<1x128xf32>
    %73 = arith.divf %71, %72 : vector<1x128xf32>
    %74 = arith.mulf %67, %67 : vector<32x128xf32>
    %cst_30 = arith.constant dense<0.000000e+00> : vector<128xf32>
    %75 = vector.multi_reduction <add>, %74, %cst_30 [0] : vector<32x128xf32> to vector<128xf32>
    %76 = vector.shape_cast %75 : vector<128xf32> to vector<1x128xf32>
    %cst_31 = arith.constant 3.200000e+01 : f32
    %77 = vector.broadcast %cst_31 : f32 to vector<1x128xf32>
    %78 = arith.divf %76, %77 : vector<1x128xf32>
    %79 = arith.mulf %73, %73 : vector<1x128xf32>
    %80 = arith.subf %78, %79 : vector<1x128xf32>
    %cst_32 = arith.constant 0.000000e+00 : f32
    %81 = vector.broadcast %cst_32 : f32 to vector<1x128xf32>
    %82 = arith.maximumf %80, %81 : vector<1x128xf32>
    %cst_33 = arith.constant 9.99999974E-6 : f32
    %83 = vector.broadcast %cst_33 : f32 to vector<1x128xf32>
    %84 = arith.addf %82, %83 : vector<1x128xf32>
    %85 = math.rsqrt %84 : vector<1x128xf32>
    %86 = arith.mulf %68, %85 : vector<1x128xf32>
    %87 = vector.broadcast %86 : vector<1x128xf32> to vector<32x128xf32>
    %88 = arith.mulf %67, %87 : vector<32x128xf32>
    %89 = arith.mulf %73, %86 : vector<1x128xf32>
    %90 = arith.subf %69, %89 : vector<1x128xf32>
    %91 = vector.broadcast %90 : vector<1x128xf32> to vector<32x128xf32>
    %92 = arith.addf %88, %91 : vector<32x128xf32>
    %cst_34 = arith.constant 0.000000e+00 : f32
    %93 = vector.broadcast %cst_34 : f32 to vector<32x128xf32>
    %94 = arith.maximumf %92, %93 : vector<32x128xf32>
    %95 = arith.truncf %94 : vector<32x128xf32> to vector<32x128xbf16>
    %c0_35 = arith.constant 0 : index
    %c0_36 = arith.constant 0 : index
    %96 = vector.load %arg7[%c0_35, %c0_36] : memref<128x128xbf16, #tpu.memory_space<vmem>>, vector<128x128xbf16>
    %cst_37 = arith.constant dense<0.000000e+00> : vector<32x128xf32>
    %97 = tpu.matmul %95, %96, %cst_37 {dimension_numbers = #tpu.dot_dimension_numbers<[1], [0], [0], [1], [0, 0, 1, 1], [], []>} : vector<32x128xbf16>, vector<128x128xbf16>, vector<32x128xf32> -> vector<32x128xf32>
    %c0_38 = arith.constant 0 : index
    %c0_39 = arith.constant 0 : index
    %98 = vector.load %arg8[%c0_38, %c0_39] : memref<1x128xf32, #tpu.memory_space<vmem>>, vector<1x128xf32>
    %c0_40 = arith.constant 0 : index
    %c0_41 = arith.constant 0 : index
    %99 = vector.load %arg9[%c0_40, %c0_41] : memref<1x128xf32, #tpu.memory_space<vmem>>, vector<1x128xf32>
    %cst_42 = arith.constant dense<0.000000e+00> : vector<128xf32>
    %100 = vector.multi_reduction <add>, %97, %cst_42 [0] : vector<32x128xf32> to vector<128xf32>
    %101 = vector.shape_cast %100 : vector<128xf32> to vector<1x128xf32>
    %cst_43 = arith.constant 3.200000e+01 : f32
    %102 = vector.broadcast %cst_43 : f32 to vector<1x128xf32>
    %103 = arith.divf %101, %102 : vector<1x128xf32>
    %104 = arith.mulf %97, %97 : vector<32x128xf32>
    %cst_44 = arith.constant dense<0.000000e+00> : vector<128xf32>
    %105 = vector.multi_reduction <add>, %104, %cst_44 [0] : vector<32x128xf32> to vector<128xf32>
    %106 = vector.shape_cast %105 : vector<128xf32> to vector<1x128xf32>
    %cst_45 = arith.constant 3.200000e+01 : f32
    %107 = vector.broadcast %cst_45 : f32 to vector<1x128xf32>
    %108 = arith.divf %106, %107 : vector<1x128xf32>
    %109 = arith.mulf %103, %103 : vector<1x128xf32>
    %110 = arith.subf %108, %109 : vector<1x128xf32>
    %cst_46 = arith.constant 0.000000e+00 : f32
    %111 = vector.broadcast %cst_46 : f32 to vector<1x128xf32>
    %112 = arith.maximumf %110, %111 : vector<1x128xf32>
    %cst_47 = arith.constant 9.99999974E-6 : f32
    %113 = vector.broadcast %cst_47 : f32 to vector<1x128xf32>
    %114 = arith.addf %112, %113 : vector<1x128xf32>
    %115 = math.rsqrt %114 : vector<1x128xf32>
    %116 = arith.mulf %98, %115 : vector<1x128xf32>
    %117 = vector.broadcast %116 : vector<1x128xf32> to vector<32x128xf32>
    %118 = arith.mulf %97, %117 : vector<32x128xf32>
    %119 = arith.mulf %103, %116 : vector<1x128xf32>
    %120 = arith.subf %99, %119 : vector<1x128xf32>
    %121 = vector.broadcast %120 : vector<1x128xf32> to vector<32x128xf32>
    %122 = arith.addf %118, %121 : vector<32x128xf32>
    %c0_48 = arith.constant 0 : index
    %c0_49 = arith.constant 0 : index
    %123 = vector.load %arg10[%c0_48, %c0_49] : memref<128x128xbf16, #tpu.memory_space<vmem>>, vector<128x128xbf16>
    %cst_50 = arith.constant dense<0.000000e+00> : vector<32x128xf32>
    %124 = tpu.matmul %1, %123, %cst_50 {dimension_numbers = #tpu.dot_dimension_numbers<[1], [0], [0], [1], [0, 0, 1, 1], [], []>} : vector<32x128xbf16>, vector<128x128xbf16>, vector<32x128xf32> -> vector<32x128xf32>
    %c0_51 = arith.constant 0 : index
    %c0_52 = arith.constant 0 : index
    %125 = vector.load %arg11[%c0_51, %c0_52] : memref<1x128xf32, #tpu.memory_space<vmem>>, vector<1x128xf32>
    %c0_53 = arith.constant 0 : index
    %c0_54 = arith.constant 0 : index
    %126 = vector.load %arg12[%c0_53, %c0_54] : memref<1x128xf32, #tpu.memory_space<vmem>>, vector<1x128xf32>
    %cst_55 = arith.constant dense<0.000000e+00> : vector<128xf32>
    %127 = vector.multi_reduction <add>, %124, %cst_55 [0] : vector<32x128xf32> to vector<128xf32>
    %128 = vector.shape_cast %127 : vector<128xf32> to vector<1x128xf32>
    %cst_56 = arith.constant 3.200000e+01 : f32
    %129 = vector.broadcast %cst_56 : f32 to vector<1x128xf32>
    %130 = arith.divf %128, %129 : vector<1x128xf32>
    %131 = arith.mulf %124, %124 : vector<32x128xf32>
    %cst_57 = arith.constant dense<0.000000e+00> : vector<128xf32>
    %132 = vector.multi_reduction <add>, %131, %cst_57 [0] : vector<32x128xf32> to vector<128xf32>
    %133 = vector.shape_cast %132 : vector<128xf32> to vector<1x128xf32>
    %cst_58 = arith.constant 3.200000e+01 : f32
    %134 = vector.broadcast %cst_58 : f32 to vector<1x128xf32>
    %135 = arith.divf %133, %134 : vector<1x128xf32>
    %136 = arith.mulf %130, %130 : vector<1x128xf32>
    %137 = arith.subf %135, %136 : vector<1x128xf32>
    %cst_59 = arith.constant 0.000000e+00 : f32
    %138 = vector.broadcast %cst_59 : f32 to vector<1x128xf32>
    %139 = arith.maximumf %137, %138 : vector<1x128xf32>
    %cst_60 = arith.constant 9.99999974E-6 : f32
    %140 = vector.broadcast %cst_60 : f32 to vector<1x128xf32>
    %141 = arith.addf %139, %140 : vector<1x128xf32>
    %142 = math.rsqrt %141 : vector<1x128xf32>
    %143 = arith.mulf %125, %142 : vector<1x128xf32>
    %144 = vector.broadcast %143 : vector<1x128xf32> to vector<32x128xf32>
    %145 = arith.mulf %124, %144 : vector<32x128xf32>
    %146 = arith.mulf %130, %143 : vector<1x128xf32>
    %147 = arith.subf %126, %146 : vector<1x128xf32>
    %148 = vector.broadcast %147 : vector<1x128xf32> to vector<32x128xf32>
    %149 = arith.addf %145, %148 : vector<32x128xf32>
    %150 = arith.addf %122, %149 : vector<32x128xf32>
    %cst_61 = arith.constant 0.000000e+00 : f32
    %151 = vector.broadcast %cst_61 : f32 to vector<32x128xf32>
    %152 = arith.maximumf %150, %151 : vector<32x128xf32>
    %c0_62 = arith.constant 0 : index
    %c0_63 = arith.constant 0 : index
    %153 = vector.load %arg13[%c0_62, %c0_63] : memref<32x128xf32, #tpu.memory_space<vmem>>, vector<32x128xf32>
    tpu.vector_store %arg13[%c0_62, %c0_63], %152 {strides = array<i32>} : memref<32x128xf32, #tpu.memory_space<vmem>>, vector<32x128xf32>,
    return
  }
}

</mosaic_0001>

<bundles_post_ra>
// kernel: bottleneck_forward.1
= control target key start
LH: loop header
LB: loop body
LE: loop exit
PB: predicated region body
PF: predicated region fallthrough
CT: control target
= control target key end

     0   :  { %vm1305_vm5 = vmmov 1   ;;  %s1620_s1 = inlined_call_operand.vmem [shape: bf16[128,128], index: 1, kind: input, shape index: {}]   ;;  %s1621_s0 = inlined_call_operand.vmem [shape: f32[32,128], index: 0, kind: input, shape index: {}]   ;;  %s1622_s4 = inlined_call_operand.vmem [shape: bf16[384,128], index: 4, kind: input, shape index: {}]   ;;  %s1623_s10 = inlined_call_operand.vmem [shape: bf16[128,128], index: 10, kind: input, shape index: {}]   ;;  %s1624_s2 = inlined_call_operand.vmem [shape: f32[1,128], index: 2, kind: input, shape index: {}]   ;;  %s1625_s3 = inlined_call_operand.vmem [shape: f32[1,128], index: 3, kind: input, shape index: {}]   ;;  %s1626_s7 = inlined_call_operand.vmem [shape: bf16[128,128], index: 7, kind: input, shape index: {}]   ;;  %s1627_s5 = inlined_call_operand.vmem [shape: f32[1,128], index: 5, kind: input, shape index: {}]   ;;  %s1628_s6 = inlined_call_operand.vmem [shape: f32[1,128], index: 6, kind: input, shape index: {}]   ;;  %s1629_s11 = inlined_call_operand.vmem [shape: f32[1,128], index: 11, kind: input, shape index: {}]   ;;  %s1630_s12 = inlined_call_operand.vmem [shape: f32[1,128], index: 12, kind: input, shape index: {}]   ;;  %s1631_s8 = inlined_call_operand.vmem [shape: f32[1,128], index: 8, kind: input, shape index: {}]   ;;  %s1632_s9 = inlined_call_operand.vmem [shape: f32[1,128], index: 9, kind: input, shape index: {}]   ;;  %s1633_s13 = inlined_call_operand.vmem [shape: f32[32,128], index: 13, kind: output, shape index: {}]  }
   0x1   :  { %v1249_v0 = vld [vmem:[%s1620_s1] sm:$0xff]   ;;  %v1250_v1 = vld [vmem:[%s1620_s1 + $0x8] sm:$0xff]   ;;  %v1251_v2 = vld [vmem:[%s1620_s1 + $0x10] sm:$0xff]  }
   0x2   :  { %1168 = vmatprep.subr.bf16.mxu0 %v1249_v0  ;;  %v1252_v3 = vld [vmem:[%s1620_s1 + $0x18] sm:$0xff]   ;;  %v45_v4 = vld [vmem:[%s1621_s0] sm:$0xff]  ;;  %v46_v5 = vld [vmem:[%s1621_s0 + $0x8] sm:$0xff] }
   0x3   :  { %1169 = vmatpush3.bf16.msra.mxu0 %v1249_v0  ;;  %v1394_v6 = vpack.c.bf16 %v46_v5, %v45_v4  ;;  %v1253_v7 = vld [vmem:[%s1620_s1 + $0x20] sm:$0xff]   ;;  %v1254_v8 = vld [vmem:[%s1620_s1 + $0x28] sm:$0xff]   ;;  %v1255_v9 = vld [vmem:[%s1620_s1 + $0x30] sm:$0xff]  }
   0x4   :  { %1170 = vmatprep.subr.bf16.mxu0 %v1250_v1  ;;  %v1256_v10 = vld [vmem:[%s1620_s1 + $0x38] sm:$0xff]   ;;  %v47_v11 = vld [vmem:[%s1621_s0 + $0x10] sm:$0xff]  ;;  %v1257_v14 = vld [vmem:[%s1622_s4 + $0x40] sm:$0xff]  }
   0x5   :  { %1184 = vmatprep.mubr.bf16.mxu0 %v1394_v6  ;;  %v48_v12 = vld [vmem:[%s1621_s0 + $0x18] sm:$0xff]  ;;  %v1258_v15 = vld [vmem:[%s1622_s4] sm:$0xff]   ;;  %1110 = vmatprep.subr.bf16.mxu1 %v1257_v14  ;;  %v1260_v17 = vld [vmem:[%s1622_s4 + $0x48] sm:$0xff]  }
   0x6   :  { %v1415_v13 = vpack.c.bf16 %v48_v12, %v47_v11  ;;  %v1259_v16 = vld [vmem:[%s1622_s4 + $0x80] sm:$0xff]   ;;  %1111 = vmatpush3.bf16.msra.mxu1 %v1258_v15  ;;  %v1261_v18 = vld [vmem:[%s1622_s4 + $0x8] sm:$0xff]   ;;  %v1263_v20 = vld [vmem:[%s1622_s4 + $0x50] sm:$0xff]  }
   0x7   :  { %1171 = vmatpush3.bf16.msra.mxu0 %v1250_v1  ;;  %v1262_v19 = vld [vmem:[%s1622_s4 + $0x88] sm:$0xff]   ;;  %1112 = vmatprep.subr.bf16.mxu1 %v1260_v17  ;;  %v1264_v21 = vld [vmem:[%s1622_s4 + $0x10] sm:$0xff]   ;;  %v1266_v23 = vld [vmem:[%s1622_s4 + $0x58] sm:$0xff]  }
   0x8   :  { %1172 = vmatprep.subr.bf16.mxu0 %v1251_v2  ;;  %v1265_v22 = vld [vmem:[%s1622_s4 + $0x90] sm:$0xff]   ;;  %v1267_v24 = vld [vmem:[%s1622_s4 + $0x18] sm:$0xff]   ;;  %v1269_v26 = vld [vmem:[%s1622_s4 + $0x60] sm:$0xff]  }
   0x9   :  { %v1268_v25 = vld [vmem:[%s1622_s4 + $0x98] sm:$0xff]   ;;  %v1270_v27 = vld [vmem:[%s1622_s4 + $0x20] sm:$0xff]   ;;  %v1272_v29 = vld [vmem:[%s1622_s4 + $0x68] sm:$0xff]  }
   0xa   :  { %1113 = vmatpush3.bf16.msra.mxu1 %v1261_v18  ;;  %v1271_v28 = vld [vmem:[%s1622_s4 + $0xa0] sm:$0xff]   ;;  %v1273_v30 = vld [vmem:[%s1622_s4 + $0x28] sm:$0xff]   ;;  %v1275_v32 = vld [vmem:[%s1622_s4 + $0x70] sm:$0xff]  }
   0xb   :  { %1173 = vmatpush3.bf16.msra.mxu0 %v1251_v2  ;;  %1114 = vmatprep.subr.bf16.mxu1 %v1263_v20  ;;  %v1274_v31 = vld [vmem:[%s1622_s4 + $0xa8] sm:$0xff]   ;;  %v1277_v33 = vld [vmem:[%s1622_s4 + $0xb0] sm:$0xff]   ;;  %v1278_v35 = vld [vmem:[%s1622_s4 + $0x78] sm:$0xff]  }
   0xc   :  { %1174 = vmatprep.subr.bf16.mxu0 %v1252_v3  ;;  %v1276_v34 = vld [vmem:[%s1622_s4 + $0x30] sm:$0xff]   ;;  %v1279_v36 = vld [vmem:[%s1622_s4 + $0x38] sm:$0xff]   ;;  %v1493_v38 = vld [vmem:[%s1623_s10] sm:$0xff]  }
   0xd   :  { %v1280_v37 = vld [vmem:[%s1622_s4 + $0xb8] sm:$0xff]   ;;  %v165_v17 = vld [vmem:[%s1625_s3] sm:$0x1] }
   0xe   :  { %1115 = vmatpush3.bf16.msra.mxu1 %v1264_v21 }
   0xf   :  { %1175 = vmatpush3.bf16.msra.mxu0 %v1252_v3  ;;  %1116 = vmatprep.subr.bf16.mxu1 %v1266_v23 }
  0x10   :  { %1176 = vmatprep.subr.bf16.mxu0 %v1253_v7 }
  0x12   :  { %1117 = vmatpush3.bf16.msra.mxu1 %v1267_v24 }
  0x13   :  { %1177 = vmatpush3.bf16.msra.mxu0 %v1253_v7  ;;  %1118 = vmatprep.subr.bf16.mxu1 %v1269_v26 }
  0x14   :  { %1178 = vmatprep.subr.bf16.mxu0 %v1254_v8 }
  0x16   :  { %1119 = vmatpush3.bf16.msra.mxu1 %v1270_v27 }
  0x17   :  { %1179 = vmatpush3.bf16.msra.mxu0 %v1254_v8  ;;  %1120 = vmatprep.subr.bf16.mxu1 %v1272_v29  ;;  %v198_v8 = vlaneseq }
  0x18   :  { %1180 = vmatprep.subr.bf16.mxu0 %v1255_v9 }
  0x1a   :  { %1121 = vmatpush3.bf16.msra.mxu1 %v1273_v30 }
  0x1b   :  { %1181 = vmatpush3.bf16.msra.mxu0 %v1255_v9  ;;  %1122 = vmatprep.subr.bf16.mxu1 %v1275_v32  ;;  %v199_v9 = vshrl.u32 %v198_v8, 7  ;;  %v1290_v8 = vld [vmem:[%s1626_s7 + $0x8] sm:$0xff]  }
  0x1c   :  { %1182 = vmatprep.subr.bf16.mxu0 %v1256_v10 }
  0x1d   :  { %v1499_v11 = vsub.s32 0, %v199_v9  ;;  %v225_v18 = vadd.s32 8, %v199_v9  ;;  %v232_v26 = vand.u32 15, %v199_v9  ;;  %vm284_vm0 = vcmp.lt.s32.totalorder %v199_v9, 1 }
  0x1e   :  { %1123 = vmatpush3.bf16.msra.mxu1 %v1276_v34  ;;  %vm309_vm1 = vcmp.lt.s32.totalorder %v199_v9, 7 }
  0x1f   :  { %1183 = vmatpush3.bf16.msra.mxu0 %v1256_v10  ;;  %1124 = vmatprep.subr.bf16.mxu1 %v1278_v35  ;;  %v164_v10 = vld [vmem:[%s1624_s2] sm:$0x1]  ;;  %v239_v27 = vand.u32 15, %v225_v18  ;;  %vm1096_vm2 = vcmp.ne.s32.totalorder %v232_v26, 0 }
  0x20   :  { %1188 = vmatprep.subr.bf16.mxu0 %v1259_v16  ;;  %vm1516_vm6 = vmpackc.low %vm1305_vm5, %vm1096_vm2 }
  0x21   :  { %vm1506_vm3 = vcmp.ne.s32.totalorder %v239_v27, 15 }
  0x22   :  { %1185 = vmatmul.mubr.bf16.vlgmr.msra.gmra.mrb[0].mxu0 %v1415_v13  ;;  %1125 = vmatpush3.bf16.msra.mxu1 %v1279_v36  ;;  %vm1073_vm7 = vmpackc.low %vm1506_vm3, %vm1305_vm5 }
  0x23   :  { %1189 = vmatpush3.bf16.msra.mxu0 %v1259_v16 }
  0x24   :  { %1190 = vmatprep.subr.bf16.mxu0 %v1262_v19 }
  0x27   :  { %1191 = vmatpush3.bf16.msra.mxu0 %v1262_v19  ;;  %v227_v19 = vadd.s32 24, %v199_v9 }
  0x28   :  { %1192 = vmatprep.subr.bf16.mxu0 %v1265_v22 }
  0x2b   :  { %1193 = vmatpush3.bf16.msra.mxu0 %v1265_v22 }
  0x2c   :  { %1194 = vmatprep.subr.bf16.mxu0 %v1268_v25 }
  0x2f   :  { %1195 = vmatpush3.bf16.msra.mxu0 %v1268_v25 }
  0x30   :  { %1196 = vmatprep.subr.bf16.mxu0 %v1271_v28 }
  0x33   :  { %1197 = vmatpush3.bf16.msra.mxu0 %v1271_v28  ;;  %v253_v28 = vand.u32 15, %v227_v19 }
  0x34   :  { %1198 = vmatprep.subr.bf16.mxu0 %v1274_v31 }
  0x35   :  { %vm1510_vm4 = vcmp.ne.s32.totalorder %v253_v28, 15 }
  0x36   :  { %vm1077_vm8 = vmpackc.low %vm1510_vm4, %vm1305_vm5 }
  0x37   :  { %1199 = vmatpush3.bf16.msra.mxu0 %v1274_v31 }
  0x38   :  { %1200 = vmatprep.subr.bf16.mxu0 %v1277_v33 }
  0x3b   :  { %1201 = vmatpush3.bf16.msra.mxu0 %v1277_v33 }
  0x3c   :  { %1202 = vmatprep.subr.bf16.mxu0 %v1280_v37 }
  0x3f   :  { %1203 = vmatpush3.bf16.msra.mxu0 %v1280_v37 }
  0x40   :  { %1228 = vmatprep.subr.bf16.mxu0 %v1493_v38 }
  0xf5   :  { %v1186_v39 = vpop.f32.mrb[0].mxu0 }
  0xf6   :  { %v149_v40 = vpop.f32.mrb[1].mxu0  ;;  %v179_v46 = vmul.f32 %v1186_v39, %v1186_v39 }
  0xf7   :  { %v1187_v41 = vpop.f32.mrb[2].mxu0  ;;  %v177_v43 = vmul.f32 %v149_v40, %v149_v40 }
  0xf8   :  { %v152_v42 = vpop.f32.mrb[3].mxu0  ;;  %v180_v49 = vmul.f32 %v1187_v41, %v1187_v41 }
  0xf9   :  { %v166_v44 = vadd.f32 %v152_v42, %v149_v40  ;;  %v178_v45 = vmul.f32 %v152_v42, %v152_v42 }
  0xfb   :  { %v167_v47 = vadd.f32 %v1186_v39, %v166_v44  ;;  %v181_v48 = vadd.f32 %v178_v45, %v177_v43 }
  0xfd   :  { %v168_v50 = vadd.f32 %v1187_v41, %v167_v47  ;;  %v182_v51 = vadd.f32 %v181_v48, %v179_v46 }
  0xff   :  { %v169_v52 = vrot.slane %v168_v50, 4  ;;  %v183_v53 = vadd.f32 %v182_v51, %v180_v49 }
 0x101   :  { %v170_v54 = vadd.f32 %v169_v52, %v168_v50  ;;  %v184_v55 = vrot.slane %v183_v53, 4 }
 0x103   :  { %v171_v56 = vrot.slane %v170_v54, 2  ;;  %v185_v57 = vadd.f32 %v184_v55, %v183_v53 }
 0x105   :  { %v172_v58 = vadd.f32 %v171_v56, %v170_v54  ;;  %v186_v59 = vrot.slane %v185_v57, 2 }
 0x107   :  { %v173_v60 = vrot.slane %v172_v58, 1  ;;  %v187_v61 = vadd.f32 %v186_v59, %v185_v57 }
 0x109   :  { %v174_v62 = vadd.f32 %v173_v60, %v172_v58  ;;  %v188_v63 = vrot.slane %v187_v61, 1 }
 0x10b   :  { %v176_v0 = vmul.f32 0.03125, %v174_v62  ;;  %v189_v1 = vadd.f32 %v188_v63, %v187_v61 }
 0x10d   :  { %v190_v2 = vmul.f32 0.03125, %v189_v1  ;;  %v191_v3 = vmul.f32 %v176_v0, %v176_v0 }
 0x10f   :  { %v192_v4 = vsub.f32 %v190_v2, %v191_v3  ;;  %v1283_v2 = vld [vmem:[%s1623_s10 + $0x10] sm:$0xff]   ;;  %v1284_v3 = vld [vmem:[%s1623_s10 + $0x18] sm:$0xff]  }
 0x111   :  { %v193_v5 = vmax.f32 %v192_v4, 0.0  ;;  %v1287_v4 = vld [vmem:[%s1623_s10 + $0x30] sm:$0xff]  }
 0x113   :  { %v194_v7 = vadd.f32 1e-05, %v193_v5  ;;  %v1288_v5 = vld [vmem:[%s1623_s10 + $0x38] sm:$0xff]  }
 0x115   :  { %1297 = vrsqrt.f32 %v194_v7  ;;  %v1289_v7 = vld [vmem:[%s1626_s7] sm:$0xff]  }
 0x116   :  { %1208 = vmatprep.subr.bf16.mxu1 %v1289_v7 }
 0x11f   :  { %v1298_v12 = vpop.eup %1297 }
 0x120   :  { %v196_v14 = vmul.f32 %v1298_v12, %v164_v10  ;;  %v1293_v10 = vld [vmem:[%s1626_s7 + $0x20] sm:$0xff]   ;;  %v1294_v12 = vld [vmem:[%s1626_s7 + $0x28] sm:$0xff]  }
 0x122   :  { %v201_v15 = vrot.slane %v196_v14, %v1499_v11  ;;  %v207_v16 = vmul.f32 %v196_v14, %v176_v0  ;;  %v1282_v0 = vld [vmem:[%s1623_s10 + $0x8] sm:$0xff]   ;;  %v1295_v14 = vld [vmem:[%s1626_s7 + $0x30] sm:$0xff]  }
 0x124   :  { %v204_v20 = vmul.f32 %v201_v15, %v152_v42  ;;  %v205_v21 = vmul.f32 %v1186_v39, %v201_v15  ;;  %v206_v22 = vmul.f32 %v1187_v41, %v201_v15  ;;  %v203_v23 = vmul.f32 %v201_v15, %v149_v40  ;;  %v1296_v15 = vld [vmem:[%s1626_s7 + $0x38] sm:$0xff]  }
 0x125   :  { %v208_v24 = vsub.f32 %v165_v17, %v207_v16  ;;  %v226_v40 = vadd.s32 16, %v199_v9  ;;  %v1291_v9 = vld [vmem:[%s1626_s7 + $0x10] sm:$0xff]  }
 0x127   :  { %v213_v25 = vrot.slane %v208_v24, %v1499_v11  ;;  %v246_v56 = vand.u32 15, %v226_v40 }
 0x129   :  { %v215_v29 = vadd.f32 %v213_v25, %v203_v23  ;;  %v216_v30 = vadd.f32 %v213_v25, %v204_v20  ;;  %v218_v31 = vadd.f32 %v213_v25, %v206_v22  ;;  %v217_v32 = vadd.f32 %v213_v25, %v205_v21 }
 0x12a   :  { %vm1097_vm9 = vcmp.ne.s32.totalorder %v246_v56, 0 }
 0x12b   :  { %v219_v33 = vmax.f32 %v215_v29, 0.0  ;;  %v220_v34 = vmax.f32 %v216_v30, 0.0  ;;  %v222_v35 = vmax.f32 %v218_v31, 0.0  ;;  %v221_v36 = vmax.f32 %v217_v32, 0.0  ;;  %vm1069_vm10 = vmpackc.low %vm1305_vm5, %vm1097_vm9 }
 0x12d   :  { %v280_v41 = vrot.slane %v219_v33, 7  ;;  %v281_v42 = vrot.slane %v220_v34, 7  ;;  %v305_v43 = vrot.slane %v219_v33, 1  ;;  %v306_v44 = vrot.slane %v220_v34, 1 }
 0x12e   :  { %v328_v45 = vpack.c.bf16 %v220_v34, %v219_v33  ;;  %v283_v46 = vrot.slane %v222_v35, 7  ;;  %v307_v47 = vrot.slane %v221_v36, 1  ;;  %v329_v48 = vpack.c.bf16 %v222_v35, %v221_v36 }
 0x12f   :  { %v287_v49 = vsel %vm284_vm0, %v280_v41, %v281_v42  ;;  %v312_v51 = vsel %vm309_vm1, %v305_v43, %v306_v44  ;;  %v308_v52 = vrot.slane %v222_v35, 1  ;;  %v282_v53 = vrot.slane %v221_v36, 7 }
 0x130   :  { %556 = vmatprep.mubr.bf16.mxu1 %v328_v45  ;;  %v288_v54 = vsel %vm284_vm0, %v283_v46, %v280_v41  ;;  %v311_v55 = vsel %vm309_vm1, %v306_v44, %v307_v47 }
 0x131   :  { %v1066_v57 = vpack.c.bf16 %v287_v49, %v288_v54  ;;  %v1074_v58 = vpack.c.bf16 %v311_v55, %v312_v51  ;;  %v310_v59 = vsel %vm309_vm1, %v307_v47, %v308_v52  ;;  %v313_v60 = vsel %vm309_vm1, %v308_v52, %v305_v43 }
 0x132   :  { %v1078_v61 = vpack.c.bf16 %v313_v60, %v310_v59  ;;  %v285_v62 = vsel %vm284_vm0, %v282_v53, %v283_v46  ;;  %v286_v63 = vsel %vm284_vm0, %v281_v42, %v282_v53 }
 0x133   :  { %1067 = vmatmul.mubr.msk.bf16.vlgmr.msra.gmra.mrb[0].mxu1 %vm1516_vm6, %v1066_v57  ;;  %1204 = vmatprep.mubr.msk.bf16.mxu0 %vm1073_vm7, %v1074_v58  ;;  %v1070_v1 = vpack.c.bf16 %v285_v62, %v286_v63 }
 0x134   :  { %564 = vmatprep.mubr.bf16.mxu1 %v329_v48  ;;  %1205 = vmatmul.mubr.msk.bf16.vlgmr.msra.gmra.mrb[4].mxu0 %vm1077_vm8, %v1078_v61 }
 0x135   :  { %1229 = vmatpush3.bf16.msra.mxu0 %v1493_v38  ;;  %1244 = vmatprep.mubr.bf16.mxu0 %v1394_v6  ;;  %v1285_v6 = vld [vmem:[%s1623_s10 + $0x20] sm:$0xff]   ;;  %v1286_v38 = vld [vmem:[%s1623_s10 + $0x28] sm:$0xff]  }
 0x136   :  { %1230 = vmatprep.subr.bf16.mxu0 %v1282_v0  ;;  %1209 = vmatpush3.bf16.msra.mxu1 %v1289_v7 }
 0x137   :  { %1210 = vmatprep.subr.bf16.mxu1 %v1290_v8 }
 0x139   :  { %1231 = vmatpush3.bf16.msra.mxu0 %v1282_v0 }
 0x13a   :  { %1232 = vmatprep.subr.bf16.mxu0 %v1283_v2  ;;  %1211 = vmatpush3.bf16.msra.mxu1 %v1290_v8 }
 0x13b   :  { %1071 = vmatmul.mubr.msk.bf16.gmra.mrb[4].mxu1 %vm1069_vm10, %v1070_v1  ;;  %1212 = vmatprep.subr.bf16.mxu1 %v1291_v9  ;;  %v622_v1 = vld [vmem:[%s1627_s5] sm:$0x1] }
 0x13d   :  { %1233 = vmatpush3.bf16.msra.mxu0 %v1283_v2 }
 0x13e   :  { %1234 = vmatprep.subr.bf16.mxu0 %v1284_v3  ;;  %1213 = vmatpush3.bf16.msra.mxu1 %v1291_v9 }
 0x141   :  { %1235 = vmatpush3.bf16.msra.mxu0 %v1284_v3 }
 0x142   :  { %1236 = vmatprep.subr.bf16.mxu0 %v1285_v6 }
 0x145   :  { %1237 = vmatpush3.bf16.msra.mxu0 %v1285_v6  ;;  %v623_v6 = vld [vmem:[%s1628_s6] sm:$0x1] }
 0x146   :  { %1238 = vmatprep.subr.bf16.mxu0 %v1286_v38 }
 0x149   :  { %1239 = vmatpush3.bf16.msra.mxu0 %v1286_v38 }
 0x14a   :  { %1240 = vmatprep.subr.bf16.mxu0 %v1287_v4 }
 0x14d   :  { %1241 = vmatpush3.bf16.msra.mxu0 %v1287_v4 }
 0x14e   :  { %1242 = vmatprep.subr.bf16.mxu0 %v1288_v5 }
 0x151   :  { %1243 = vmatpush3.bf16.msra.mxu0 %v1288_v5 }
 0x154   :  { %1245 = vmatmul.mubr.bf16.vlgmr.msra.gmra.mrb[8].mxu0 %v1415_v13  ;;  %v1292_v13 = vld [vmem:[%s1626_s7 + $0x18] sm:$0xff]  }
 0x155   :  { %1214 = vmatprep.subr.bf16.mxu1 %v1292_v13 }
 0x156   :  { %1215 = vmatpush3.bf16.msra.mxu1 %v1292_v13 }
 0x157   :  { %1216 = vmatprep.subr.bf16.mxu1 %v1293_v10 }
 0x15a   :  { %1217 = vmatpush3.bf16.msra.mxu1 %v1293_v10 }
 0x15b   :  { %1218 = vmatprep.subr.bf16.mxu1 %v1294_v12 }
 0x15e   :  { %1219 = vmatpush3.bf16.msra.mxu1 %v1294_v12 }
 0x15f   :  { %1220 = vmatprep.subr.bf16.mxu1 %v1295_v14 }
 0x162   :  { %1221 = vmatpush3.bf16.msra.mxu1 %v1295_v14 }
 0x163   :  { %1222 = vmatprep.subr.bf16.mxu1 %v1296_v15 }
 0x166   :  { %1223 = vmatpush3.bf16.msra.mxu1 %v1296_v15 }
 0x206   :  { %v1126_v16 = vpop.f32.mrb[0].mxu1 }
 0x207   :  { %v1127_v17 = vpop.f32.mrb[1].mxu1  ;;  %v1206_v18 = vpop.f32.mrb[4].mxu0 }
 0x208   :  { %v1128_v19 = vadd.f32 %v1127_v17, %v1126_v16  ;;  %v1129_v20 = vpop.f32.mrb[2].mxu1  ;;  %v607_v21 = vpop.f32.mrb[5].mxu0 }
 0x209   :  { %v1130_v22 = vpop.f32.mrb[3].mxu1  ;;  %v1207_v23 = vpop.f32.mrb[6].mxu0 }
 0x20a   :  { %v608_v24 = vadd.f32 %v1128_v19, %v607_v21  ;;  %v1131_v25 = vadd.f32 %v1130_v22, %v1129_v20  ;;  %v610_v26 = vpop.f32.mrb[7].mxu0 }
 0x20c   :  { %v611_v27 = vadd.f32 %v1131_v25, %v610_v26  ;;  %v634_v28 = vmul.f32 %v608_v24, %v608_v24 }
 0x20e   :  { %v624_v29 = vadd.f32 %v611_v27, %v608_v24  ;;  %v635_v30 = vmul.f32 %v611_v27, %v611_v27  ;;  %v1132_v31 = vpop.f32.mrb[4].mxu1 }
 0x20f   :  { %v1133_v32 = vpop.f32.mrb[5].mxu1 }
 0x210   :  { %v638_v33 = vadd.f32 %v635_v30, %v634_v28  ;;  %v1134_v34 = vadd.f32 %v1133_v32, %v1132_v31  ;;  %v1135_v35 = vpop.f32.mrb[6].mxu1 }
 0x211   :  { %v1136_v36 = vpop.f32.mrb[7].mxu1 }
 0x212   :  { %v616_v37 = vadd.f32 %v1206_v18, %v1134_v34  ;;  %v1137_v39 = vadd.f32 %v1136_v36, %v1135_v35 }
 0x214   :  { %v625_v40 = vadd.f32 %v624_v29, %v616_v37  ;;  %v636_v41 = vmul.f32 %v616_v37, %v616_v37  ;;  %v619_v42 = vadd.f32 %v1207_v23, %v1137_v39 }
 0x216   :  { %v639_v43 = vadd.f32 %v638_v33, %v636_v41  ;;  %v626_v44 = vadd.f32 %v625_v40, %v619_v42  ;;  %v637_v45 = vmul.f32 %v619_v42, %v619_v42 }
 0x218   :  { %v627_v46 = vrot.slane %v626_v44, 4  ;;  %v640_v47 = vadd.f32 %v639_v43, %v637_v45 }
 0x21a   :  { %v628_v48 = vadd.f32 %v627_v46, %v626_v44  ;;  %v641_v49 = vrot.slane %v640_v47, 4 }
 0x21c   :  { %v629_v50 = vrot.slane %v628_v48, 2  ;;  %v642_v51 = vadd.f32 %v641_v49, %v640_v47 }
 0x21e   :  { %v630_v52 = vadd.f32 %v629_v50, %v628_v48  ;;  %v643_v53 = vrot.slane %v642_v51, 2 }
 0x220   :  { %v631_v54 = vrot.slane %v630_v52, 1  ;;  %v644_v55 = vadd.f32 %v643_v53, %v642_v51 }
 0x222   :  { %v632_v56 = vadd.f32 %v631_v54, %v630_v52  ;;  %v645_v57 = vrot.slane %v644_v55, 1 }
 0x224   :  { %v633_v58 = vmul.f32 0.03125, %v632_v56  ;;  %v646_v59 = vadd.f32 %v645_v57, %v644_v55  ;;  %v962_v56 = vld [vmem:[%s1629_s11] sm:$0x1] }
 0x226   :  { %v647_v60 = vmul.f32 0.03125, %v646_v59  ;;  %v648_v61 = vmul.f32 %v633_v58, %v633_v58  ;;  %v963_v59 = vld [vmem:[%s1630_s12] sm:$0x1] }
 0x227   :  { %v1246_v23 = vpop.f32.mrb[8].mxu0 }
 0x228   :  { %v649_v62 = vsub.f32 %v647_v60, %v648_v61  ;;  %v947_v25 = vpop.f32.mrb[9].mxu0 }
 0x229   :  { %v974_v26 = vmul.f32 %v947_v25, %v947_v25  ;;  %v1247_v28 = vpop.f32.mrb[10].mxu0 }
 0x22a   :  { %v650_v63 = vmax.f32 %v649_v62, 0.0  ;;  %v977_v31 = vmul.f32 %v1247_v28, %v1247_v28 }
 0x22c   :  { %v651_v0 = vadd.f32 1e-05, %v650_v63 }
 0x22e   :  { %1299 = vrsqrt.f32 %v651_v0 }
 0x238   :  { %v1300_v2 = vpop.eup %1299 }
 0x239   :  { %v653_v3 = vmul.f32 %v1300_v2, %v622_v1 }
 0x23b   :  { %v658_v38 = vrot.slane %v653_v3, %v1499_v11  ;;  %v664_v4 = vmul.f32 %v653_v3, %v633_v58 }
 0x23d   :  { %v662_v5 = vmul.f32 %v658_v38, %v616_v37  ;;  %v663_v7 = vmul.f32 %v658_v38, %v619_v42  ;;  %v665_v8 = vsub.f32 %v623_v6, %v664_v4  ;;  %v660_v9 = vmul.f32 %v658_v38, %v608_v24  ;;  %v950_v24 = vpop.f32.mrb[11].mxu0 }
 0x23e   :  { %v661_v13 = vmul.f32 %v658_v38, %v611_v27  ;;  %v976_v27 = vmul.f32 %v1246_v23, %v1246_v23  ;;  %v964_v29 = vadd.f32 %v950_v24, %v947_v25  ;;  %v975_v30 = vmul.f32 %v950_v24, %v950_v24 }
 0x23f   :  { %v670_v10 = vrot.slane %v665_v8, %v1499_v11 }
 0x240   :  { %v965_v32 = vadd.f32 %v1246_v23, %v964_v29  ;;  %v978_v33 = vadd.f32 %v975_v30, %v974_v26 }
 0x241   :  { %v674_v12 = vadd.f32 %v670_v10, %v662_v5  ;;  %v675_v14 = vadd.f32 %v670_v10, %v663_v7  ;;  %v672_v15 = vadd.f32 %v670_v10, %v660_v9  ;;  %v673_v16 = vadd.f32 %v670_v10, %v661_v13 }
 0x242   :  { %v966_v34 = vadd.f32 %v1247_v28, %v965_v32  ;;  %v979_v35 = vadd.f32 %v978_v33, %v976_v27 }
 0x243   :  { %v678_v17 = vmax.f32 %v674_v12, 0.0  ;;  %v679_v18 = vmax.f32 %v675_v14, 0.0  ;;  %v676_v19 = vmax.f32 %v672_v15, 0.0  ;;  %v677_v20 = vmax.f32 %v673_v16, 0.0 }
 0x244   :  { %v967_v36 = vrot.slane %v966_v34, 4  ;;  %v980_v37 = vadd.f32 %v979_v35, %v977_v31 }
 0x245   :  { %v681_v21 = vpack.c.bf16 %v679_v18, %v678_v17  ;;  %v680_v22 = vpack.c.bf16 %v677_v20, %v676_v19 }
 0x246   :  { %v968_v39 = vadd.f32 %v967_v36, %v966_v34  ;;  %v981_v40 = vrot.slane %v980_v37, 4 }
 0x247   :  { %1224 = vmatprep.mubr.bf16.mxu1 %v680_v22 }
 0x248   :  { %1225 = vmatmul.mubr.bf16.vlgmr.msra.gmra.mrb[8].mxu1 %v681_v21  ;;  %v969_v41 = vrot.slane %v968_v39, 2  ;;  %v982_v42 = vadd.f32 %v981_v40, %v980_v37 }
 0x24a   :  { %v970_v43 = vadd.f32 %v969_v41, %v968_v39  ;;  %v983_v44 = vrot.slane %v982_v42, 2  ;;  %v795_v41 = vld [vmem:[%s1631_s8] sm:$0x1] }
 0x24c   :  { %v971_v45 = vrot.slane %v970_v43, 1  ;;  %v984_v46 = vadd.f32 %v983_v44, %v982_v42  ;;  %v796_v44 = vld [vmem:[%s1632_s9] sm:$0x1] }
 0x24e   :  { %v972_v47 = vadd.f32 %v971_v45, %v970_v43  ;;  %v985_v48 = vrot.slane %v984_v46, 1 }
 0x250   :  { %v973_v49 = vmul.f32 0.03125, %v972_v47  ;;  %v986_v50 = vadd.f32 %v985_v48, %v984_v46 }
 0x252   :  { %v987_v51 = vmul.f32 0.03125, %v986_v50  ;;  %v988_v52 = vmul.f32 %v973_v49, %v973_v49 }
 0x254   :  { %v989_v53 = vsub.f32 %v987_v51, %v988_v52 }
 0x256   :  { %v990_v54 = vmax.f32 %v989_v53, 0.0 }
 0x258   :  { %v991_v55 = vadd.f32 1e-05, %v990_v54 }
 0x25a   :  { %1301 = vrsqrt.f32 %v991_v55 }
 0x264   :  { %v1302_v57 = vpop.eup %1301 }
 0x265   :  { %v993_v58 = vmul.f32 %v1302_v57, %v962_v56 }
 0x267   :  { %v998_v60 = vrot.slane %v993_v58, %v1499_v11  ;;  %v1004_v61 = vmul.f32 %v993_v58, %v973_v49 }
 0x269   :  { %v1000_v62 = vmul.f32 %v998_v60, %v947_v25  ;;  %v1001_v63 = vmul.f32 %v998_v60, %v950_v24  ;;  %v1002_v0 = vmul.f32 %v1246_v23, %v998_v60  ;;  %v1003_v1 = vmul.f32 %v1247_v28, %v998_v60 }
 0x26a   :  { %v1005_v2 = vsub.f32 %v963_v59, %v1004_v61 }
 0x26c   :  { %v1010_v3 = vrot.slane %v1005_v2, %v1499_v11 }
 0x26e   :  { %v1012_v6 = vadd.f32 %v1010_v3, %v1000_v62  ;;  %v1013_v38 = vadd.f32 %v1010_v3, %v1001_v63  ;;  %v1014_v4 = vadd.f32 %v1010_v3, %v1002_v0  ;;  %v1015_v5 = vadd.f32 %v1010_v3, %v1003_v1 }
 0x31b   :  { %v1226_v7 = vpop.f32.mrb[8].mxu1 }
 0x31c   :  { %v780_v8 = vpop.f32.mrb[9].mxu1  ;;  %v809_v15 = vmul.f32 %v1226_v7, %v1226_v7 }
 0x31d   :  { %v1227_v9 = vpop.f32.mrb[10].mxu1  ;;  %v807_v10 = vmul.f32 %v780_v8, %v780_v8 }
 0x31e   :  { %v783_v13 = vpop.f32.mrb[11].mxu1  ;;  %v810_v18 = vmul.f32 %v1227_v9, %v1227_v9 }
 0x31f   :  { %v797_v12 = vadd.f32 %v783_v13, %v780_v8  ;;  %v808_v14 = vmul.f32 %v783_v13, %v783_v13 }
 0x321   :  { %v798_v16 = vadd.f32 %v1226_v7, %v797_v12  ;;  %v811_v17 = vadd.f32 %v808_v14, %v807_v10 }
 0x323   :  { %v799_v19 = vadd.f32 %v1227_v9, %v798_v16  ;;  %v812_v20 = vadd.f32 %v811_v17, %v809_v15 }
 0x325   :  { %v800_v21 = vrot.slane %v799_v19, 4  ;;  %v813_v22 = vadd.f32 %v812_v20, %v810_v18 }
 0x327   :  { %v801_v23 = vadd.f32 %v800_v21, %v799_v19  ;;  %v814_v25 = vrot.slane %v813_v22, 4 }
 0x329   :  { %v802_v26 = vrot.slane %v801_v23, 2  ;;  %v815_v28 = vadd.f32 %v814_v25, %v813_v22 }
 0x32b   :  { %v803_v24 = vadd.f32 %v802_v26, %v801_v23  ;;  %v816_v27 = vrot.slane %v815_v28, 2 }
 0x32d   :  { %v804_v29 = vrot.slane %v803_v24, 1  ;;  %v817_v30 = vadd.f32 %v816_v27, %v815_v28 }
 0x32f   :  { %v805_v31 = vadd.f32 %v804_v29, %v803_v24  ;;  %v818_v32 = vrot.slane %v817_v30, 1 }
 0x331   :  { %v806_v33 = vmul.f32 0.03125, %v805_v31  ;;  %v819_v34 = vadd.f32 %v818_v32, %v817_v30 }
 0x333   :  { %v820_v35 = vmul.f32 0.03125, %v819_v34  ;;  %v821_v36 = vmul.f32 %v806_v33, %v806_v33 }
 0x335   :  { %v822_v37 = vsub.f32 %v820_v35, %v821_v36 }
 0x337   :  { %v823_v39 = vmax.f32 %v822_v37, 0.0 }
 0x339   :  { %v824_v40 = vadd.f32 1e-05, %v823_v39 }
 0x33b   :  { %1303 = vrsqrt.f32 %v824_v40 }
 0x345   :  { %v1304_v42 = vpop.eup %1303 }
 0x346   :  { %v826_v43 = vmul.f32 %v1304_v42, %v795_v41 }
 0x348   :  { %v831_v45 = vrot.slane %v826_v43, %v1499_v11  ;;  %v837_v46 = vmul.f32 %v826_v43, %v806_v33 }
 0x34a   :  { %v833_v47 = vmul.f32 %v831_v45, %v780_v8  ;;  %v834_v48 = vmul.f32 %v831_v45, %v783_v13  ;;  %v835_v49 = vmul.f32 %v1226_v7, %v831_v45  ;;  %v836_v50 = vmul.f32 %v1227_v9, %v831_v45 }
 0x34b   :  { %v838_v51 = vsub.f32 %v796_v44, %v837_v46 }
 0x34d   :  { %v843_v52 = vrot.slane %v838_v51, %v1499_v11 }
 0x34f   :  { %v845_v53 = vadd.f32 %v843_v52, %v833_v47  ;;  %v846_v54 = vadd.f32 %v843_v52, %v834_v48  ;;  %v847_v55 = vadd.f32 %v843_v52, %v835_v49  ;;  %v848_v56 = vadd.f32 %v843_v52, %v836_v50 }
 0x351   :  { %v1016_v57 = vadd.f32 %v1012_v6, %v845_v53  ;;  %v1017_v58 = vadd.f32 %v1013_v38, %v846_v54  ;;  %v1018_v59 = vadd.f32 %v1014_v4, %v847_v55  ;;  %v1019_v60 = vadd.f32 %v1015_v5, %v848_v56 }
 0x353   :  { %v1020_v61 = vmax.f32 %v1016_v57, 0.0  ;;  %v1021_v62 = vmax.f32 %v1017_v58, 0.0  ;;  %v1022_v63 = vmax.f32 %v1018_v59, 0.0  ;;  %v1023_v0 = vmax.f32 %v1019_v60, 0.0 }
 0x355   :  { %1024 = vst [vmem:[%s1633_s13] sm:$0xff] %v1020_v61  ;;  %1025 = vst [vmem:[%s1633_s13 + $0x8] sm:$0xff] %v1021_v62 }
 0x356   :  { %1026 = vst [vmem:[%s1633_s13 + $0x10] sm:$0xff] %v1022_v63  ;;  %1027 = vst [vmem:[%s1633_s13 + $0x18] sm:$0xff] %v1023_v0 }

</bundles_post_ra>
